<compile_context>
chip_gen: v7x
topology: tpu7x:2x2x1
jax: 0.10.0
libtpu: 0.0.40
codegen_flags: <defaults>
</compile_context>

<pallas_src>
import functools
from typing import List

import jax
import jax.numpy as jnp
from jax.experimental import pallas as pl
from jax.experimental.pallas import tpu as pltpu


_LANE = 128                 # per-layer lane-dense feature padding
_SUBLANE = 8
_SINGLE_SHOT_ROWS = 128     # at/below this, no grid: whole problem in VMEM
_VMEM_BUDGET = 40 << 20     # target working set; stays inside v7x's 64 MiB


def _round_up(x: int, m: int) -> int:
    return ((x + m - 1) // m) * m


# ---------------------------------------------------------------------------
# Fused MLP kernel: every Linear + ReLU + skip in one invocation.  The running
# activation never leaves vregs/VMEM; only x is read and the final layer's
# output written per row tile.   refs = (x, w_0..w_{L-1}, b_0..b_{L-1}, out)
# ---------------------------------------------------------------------------
def _mlp_kernel(*refs, num_layers, layer_flags):
    x_ref = refs[0]
    w_refs = refs[1:1 + num_layers]
    b_refs = refs[1 + num_layers:1 + 2 * num_layers]
    o_ref = refs[1 + 2 * num_layers]

    act = x_ref[...].astype(jnp.float32)             # x arrives as bf16
    for l in range(num_layers):                      # static unroll, L small
        apply_relu, add_skip = layer_flags[l]
        # bf16 operands feed the MXU at full rate; accumulate in f32.
        y = jnp.dot(act.astype(jnp.bfloat16), w_refs[l][...],
                    preferred_element_type=jnp.float32)
        y = y + b_refs[l][...]                       # (1, dout_pad) broadcast
        if apply_relu:
            y = jnp.maximum(y, 0.0)
        if add_skip:                                 # true in == out features
            y = y + act
        act = y
    o_ref[...] = act.astype(o_ref.dtype)


# ---------------------------------------------------------------------------
# FeedForwardSkip: params built in __init__, forward is one jitted fused call.
# ---------------------------------------------------------------------------
class FeedForwardSkip:
    def __init__(self, dim_in: int, dim_out: int, hidden_nodes: List[int],
                 use_skip_connection: bool, key: jax.Array):
        if not hidden_nodes:
            raise ValueError("hidden_nodes must be non-empty")
        self.dim_in = int(dim_in)
        self.dim_out = int(dim_out)
        self.use_skip_connection = bool(use_skip_connection)

        dims = [dim_in] + list(hidden_nodes)
        layer_io = [(dims[i], dims[i + 1], True) for i in range(len(dims) - 1)]
        layer_io.append((hidden_nodes[-1], dim_out, False))   # final: no ReLU
        self.num_layers = len(layer_io)

        # Per-layer lane-dense padding (NOT the global max width).
        self.in_pads = [_round_up(fi, _LANE) for fi, _, _ in layer_io]
        self.out_pads = [_round_up(fo, _LANE) for _, fo, _ in layer_io]

        keys = jax.random.split(key, 2 * self.num_layers)
        self.true_params = []   # (W[fi,fo] f32, b[fo] f32, relu, skip)
        self.weights = []       # per-layer padded bf16 (din_pad, dout_pad)
        self.biases = []        # per-layer padded f32   (1, dout_pad)
        flags = []
        for li, (fi, fo, relu) in enumerate(layer_io):
            bound = 1.0 / (fi ** 0.5)            # mimics torch.nn.Linear init
            w = jax.random.uniform(keys[2 * li], (fi, fo), jnp.float32,
                                   minval=-bound, maxval=bound)
            b = jax.random.uniform(keys[2 * li + 1], (fo,), jnp.float32,
                                   minval=-bound, maxval=bound)
            skip = bool(use_skip_connection and fi == fo)
            self.true_params.append((w, b, relu, skip))
            wp = jnp.zeros((self.in_pads[li], self.out_pads[li]), jnp.float32)
            wp = wp.at[:fi, :fo].set(w)
            bp = jnp.zeros((1, self.out_pads[li]), jnp.float32).at[0, :fo].set(b)
            self.weights.append(wp.astype(jnp.bfloat16))     # MXU-native
            self.biases.append(bp)                           # f32, post-acc
            flags.append((relu, skip))
        self.layer_flags = tuple(flags)

        # Static VMEM bookkeeping for the explicit budget.
        self._w_bytes = sum(int(w.size) * 2 for w in self.weights)
        self._b_bytes = sum(_SUBLANE * int(b.shape[-1]) * 4 for b in self.biases)
        self._dmax = max(self.out_pads + self.in_pads[:1])
        # TODO(synk): if the resident weight set ever exceeds the VMEM budget
        # (relevant on v7x's 64 MiB), stream weights per layer with a manual
        # make_async_copy double-buffer instead of keeping them all resident.

        self._jit_forward = jax.jit(self._forward)

    # --- VMEM sizing helpers -------------------------------------------------
    @staticmethod
    def _vmem_limit(need_bytes: int) -> int:
        # Real need + headroom, clamped to a value legal on every generation
        # (v5e/v6e: 128 MiB physical, v7x: 64 MiB physical).
        return int(min(max(int(need_bytes * 1.5) + (2 << 20), 32 << 20), 64 << 20))

    def _tile_need(self, row_tile: int, din0: int, dout_last: int) -> int:
        # resident weights/biases + double-buffered x (bf16) and out (f32)
        # tiles + headroom for intermediate activations of the widest layer.
        return (self._w_bytes + self._b_bytes
                + 2 * row_tile * din0 * 2
                + 2 * row_tile * dout_last * 4
                + 3 * row_tile * self._dmax * 4)

    def _choose_row_tile(self, mpad: int, din0: int, dout_last: int) -> int:
        for rt in (1024, 512, 256, 128):
            if mpad >= 2 * rt and self._tile_need(rt, din0, dout_last) <= _VMEM_BUDGET:
                return rt
        return 128

    # --- fused forward -------------------------------------------------------
    def _pallas_forward(self, xp):
        mpad, din0 = xp.shape
        L = self.num_layers
        dout_last = self.out_pads[-1]
        kernel = functools.partial(_mlp_kernel, num_layers=L,
                                   layer_flags=self.layer_flags)
        out_shape = jax.ShapeDtypeStruct((mpad, dout_last), jnp.float32)
        operands = (xp, *self.weights, *self.biases)
        vmem_whole = pl.BlockSpec(memory_space=pltpu.MemorySpace.VMEM)

        if mpad <= _SINGLE_SHOT_ROWS:
            # Small batch: single shot, whole problem resident in VMEM.
            need = self._tile_need(mpad, din0, dout_last)
            return pl.pallas_call(
                kernel,
                out_shape=out_shape,
                in_specs=[vmem_whole] * (1 + 2 * L),
                out_specs=vmem_whole,
                compiler_params=pltpu.CompilerParams(
                    vmem_limit_bytes=self._vmem_limit(need)),
            )(*operands)

        # Row-tiled path: weights/biases stay resident as whole-array VMEM
        # operands (copied once, single-buffered); only x / out row tiles are
        # pipelined.  Ragged last block via cdiv (no batch round-up), rows
        # split across TensorCores via the "parallel" axis (v7x: 2 TCs).
        row_tile = self._choose_row_tile(mpad, din0, dout_last)
        need = self._tile_need(row_tile, din0, dout_last)
        grid = (pl.cdiv(mpad, row_tile),)
        in_specs = [pl.BlockSpec((row_tile, din0), lambda i: (i, 0))]
        in_specs += [vmem_whole] * (2 * L)
        return pl.pallas_call(
            kernel,
            out_shape=out_shape,
            grid=grid,
            in_specs=in_specs,
            out_specs=pl.BlockSpec((row_tile, dout_last), lambda i: (i, 0)),
            compiler_params=pltpu.CompilerParams(
                dimension_semantics=("parallel",),
                vmem_limit_bytes=self._vmem_limit(need)),
        )(*operands)

    def _forward(self, x):
        m, k = x.shape
        mpad = max(_round_up(m, _SUBLANE), _SUBLANE)
        # bf16 input: the first matmul truncates to bf16 anyway, so this
        # halves the only per-row HBM read.  Rows pad to a sublane multiple,
        # features to the first layer's padded width (zeros).
        xp = jnp.pad(x.astype(jnp.bfloat16),
                     ((0, mpad - m), (0, self.in_pads[0] - k)))
        out = self._pallas_forward(xp)
        return out[:m, :self.dim_out]

    def __call__(self, x):
        return self._jit_forward(x)


# ---------------------------------------------------------------------------
# Pure-JAX references
# ---------------------------------------------------------------------------
def _reference_forward(model: FeedForwardSkip, x, *, mxu_bf16: bool = True):
    x = x.astype(jnp.float32)
    if mxu_bf16:   # kernel feeds the network a bf16 input tile
        x = x.astype(jnp.bfloat16).astype(jnp.float32)
    for (w, b, relu, skip) in model.true_params:
        if mxu_bf16:   # same math as kernel: bf16 operands, f32 accumulation
            y = jnp.dot(x.astype(jnp.bfloat16), w.astype(jnp.bfloat16),
                        preferred_element_type=jnp.float32)
        else:          # original f32 PyTorch-style math
            y = jnp.dot(x, w)
        y = y + b
        if relu:
            y = jnp.maximum(y, 0.0)
        if skip:
            y = y + x
        x = y
    return x


if __name__ == "__main__":
    key = jax.random.PRNGKey(0)
    k_param, k_x, k_x2 = jax.random.split(key, 3)

    dim_in, dim_out = 32, 32
    hidden_nodes = [32, 200, 32]      # non-uniform widths -> per-layer padding
    model = FeedForwardSkip(dim_in, dim_out, hidden_nodes,
                            use_skip_connection=True, key=k_param)

    # Small batch: single-shot (no grid) fused path.
    x = jax.random.normal(k_x, (8, dim_in), jnp.float32)
    out = jax.block_until_ready(model(x))
    assert out.shape == (8, dim_out), out.shape
    ref_same = _reference_forward(model, x, mxu_bf16=True)
    ref_f32 = _reference_forward(model, x, mxu_bf16=False)
    assert jnp.allclose(out, ref_same, atol=2e-3, rtol=2e-3), \
        float(jnp.max(jnp.abs(out - ref_same)))
    assert jnp.allclose(out, ref_f32, atol=1e-1, rtol=1e-1), \
        float(jnp.max(jnp.abs(out - ref_f32)))

    # Larger batch: row-tiled, megacore-parallel grid path with a ragged
    # last tile (600 rows -> 3 tiles of 256, last one partial).
    xb = jax.random.normal(k_x2, (600, dim_in), jnp.float32)
    outb = jax.block_until_ready(model(xb))
    assert outb.shape == (600, dim_out), outb.shape
    refb = _reference_forward(model, xb, mxu_bf16=True)
    assert jnp.allclose(outb, refb, atol=2e-3, rtol=2e-3), \
        float(jnp.max(jnp.abs(outb - refb)))

    print("KERNEL_OK")
</pallas_src>

<mosaic_0001>
module attributes {stable_mosaic.version = 11 : i64} {
  func.func @_mlp_kernel(%arg0: memref<8x128xbf16, #tpu.memory_space<vmem>>, %arg1: memref<128x128xbf16, #tpu.memory_space<vmem>>, %arg2: memref<128x256xbf16, #tpu.memory_space<vmem>>, %arg3: memref<256x128xbf16, #tpu.memory_space<vmem>>, %arg4: memref<128x128xbf16, #tpu.memory_space<vmem>>, %arg5: memref<1x128xf32, #tpu.memory_space<vmem>>, %arg6: memref<1x256xf32, #tpu.memory_space<vmem>>, %arg7: memref<1x128xf32, #tpu.memory_space<vmem>>, %arg8: memref<1x128xf32, #tpu.memory_space<vmem>>, %arg9: memref<8x128xf32, #tpu.memory_space<vmem>>) attributes {dimension_semantics = [], scalar_prefetch = 0 : i64, scratch_operands = 0 : i64, tpu.core_type = #tpu.core_type<tc>} {
    %c0 = arith.constant 0 : index
    %c0_0 = arith.constant 0 : index
    %0 = vector.load %arg0[%c0, %c0_0] : memref<8x128xbf16, #tpu.memory_space<vmem>>, vector<8x128xbf16>
    %1 = arith.extf %0 : vector<8x128xbf16> to vector<8x128xf32>
    %2 = arith.truncf %1 : vector<8x128xf32> to vector<8x128xbf16>
    %c0_1 = arith.constant 0 : index
    %c0_2 = arith.constant 0 : index
    %3 = vector.load %arg1[%c0_1, %c0_2] : memref<128x128xbf16, #tpu.memory_space<vmem>>, vector<128x128xbf16>
    %cst = arith.constant dense<0.000000e+00> : vector<8x128xf32>
    %4 = tpu.matmul %2, %3, %cst {dimension_numbers = #tpu.dot_dimension_numbers<[1], [0], [0], [1], [0, 0, 1, 1], [], []>} : vector<8x128xbf16>, vector<128x128xbf16>, vector<8x128xf32> -> vector<8x128xf32>
    %c0_3 = arith.constant 0 : index
    %c0_4 = arith.constant 0 : index
    %5 = vector.load %arg5[%c0_3, %c0_4] : memref<1x128xf32, #tpu.memory_space<vmem>>, vector<1x128xf32>
    %6 = vector.broadcast %5 : vector<1x128xf32> to vector<8x128xf32>
    %7 = arith.addf %4, %6 : vector<8x128xf32>
    %cst_5 = arith.constant 0.000000e+00 : f32
    %8 = vector.broadcast %cst_5 : f32 to vector<8x128xf32>
    %9 = arith.maximumf %7, %8 : vector<8x128xf32>
    %10 = arith.addf %9, %1 : vector<8x128xf32>
    %11 = arith.truncf %10 : vector<8x128xf32> to vector<8x128xbf16>
    %c0_6 = arith.constant 0 : index
    %c0_7 = arith.constant 0 : index
    %12 = vector.load %arg2[%c0_6, %c0_7] : memref<128x256xbf16, #tpu.memory_space<vmem>>, vector<128x256xbf16>
    %cst_8 = arith.constant dense<0.000000e+00> : vector<8x256xf32>
    %13 = tpu.matmul %11, %12, %cst_8 {dimension_numbers = #tpu.dot_dimension_numbers<[1], [0], [0], [1], [0, 0, 1, 1], [], []>} : vector<8x128xbf16>, vector<128x256xbf16>, vector<8x256xf32> -> vector<8x256xf32>
    %c0_9 = arith.constant 0 : index
    %c0_10 = arith.constant 0 : index
    %14 = vector.load %arg6[%c0_9, %c0_10] : memref<1x256xf32, #tpu.memory_space<vmem>>, vector<1x256xf32>
    %15 = vector.broadcast %14 : vector<1x256xf32> to vector<8x256xf32>
    %16 = arith.addf %13, %15 : vector<8x256xf32>
    %cst_11 = arith.constant 0.000000e+00 : f32
    %17 = vector.broadcast %cst_11 : f32 to vector<8x256xf32>
    %18 = arith.maximumf %16, %17 : vector<8x256xf32>
    %19 = arith.truncf %18 : vector<8x256xf32> to vector<8x256xbf16>
    %c0_12 = arith.constant 0 : index
    %c0_13 = arith.constant 0 : index
    %20 = vector.load %arg3[%c0_12, %c0_13] : memref<256x128xbf16, #tpu.memory_space<vmem>>, vector<256x128xbf16>
    %cst_14 = arith.constant dense<0.000000e+00> : vector<8x128xf32>
    %21 = tpu.matmul %19, %20, %cst_14 {dimension_numbers = #tpu.dot_dimension_numbers<[1], [0], [0], [1], [0, 0, 1, 1], [], []>} : vector<8x256xbf16>, vector<256x128xbf16>, vector<8x128xf32> -> vector<8x128xf32>
    %c0_15 = arith.constant 0 : index
    %c0_16 = arith.constant 0 : index
    %22 = vector.load %arg7[%c0_15, %c0_16] : memref<1x128xf32, #tpu.memory_space<vmem>>, vector<1x128xf32>
    %23 = vector.broadcast %22 : vector<1x128xf32> to vector<8x128xf32>
    %24 = arith.addf %21, %23 : vector<8x128xf32>
    %cst_17 = arith.constant 0.000000e+00 : f32
    %25 = vector.broadcast %cst_17 : f32 to vector<8x128xf32>
    %26 = arith.maximumf %24, %25 : vector<8x128xf32>
    %27 = arith.truncf %26 : vector<8x128xf32> to vector<8x128xbf16>
    %c0_18 = arith.constant 0 : index
    %c0_19 = arith.constant 0 : index
    %28 = vector.load %arg4[%c0_18, %c0_19] : memref<128x128xbf16, #tpu.memory_space<vmem>>, vector<128x128xbf16>
    %cst_20 = arith.constant dense<0.000000e+00> : vector<8x128xf32>
    %29 = tpu.matmul %27, %28, %cst_20 {dimension_numbers = #tpu.dot_dimension_numbers<[1], [0], [0], [1], [0, 0, 1, 1], [], []>} : vector<8x128xbf16>, vector<128x128xbf16>, vector<8x128xf32> -> vector<8x128xf32>
    %c0_21 = arith.constant 0 : index
    %c0_22 = arith.constant 0 : index
    %30 = vector.load %arg8[%c0_21, %c0_22] : memref<1x128xf32, #tpu.memory_space<vmem>>, vector<1x128xf32>
    %31 = vector.broadcast %30 : vector<1x128xf32> to vector<8x128xf32>
    %32 = arith.addf %29, %31 : vector<8x128xf32>
    %33 = arith.addf %32, %26 : vector<8x128xf32>
    %c0_23 = arith.constant 0 : index
    %c0_24 = arith.constant 0 : index
    %34 = vector.load %arg9[%c0_23, %c0_24] : memref<8x128xf32, #tpu.memory_space<vmem>>, vector<8x128xf32>
    tpu.vector_store %arg9[%c0_23, %c0_24], %33 {strides = array<i32>} : memref<8x128xf32, #tpu.memory_space<vmem>>, vector<8x128xf32>,
    return
  }
}

</mosaic_0001>

<bundles_post_ra>
// kernel: _forward.1
= control target key start
LH: loop header
LB: loop body
LE: loop exit
PB: predicated region body
PF: predicated region fallthrough
CT: control target
= control target key end

     0   :  { %v822_v1 = vmov 0.0   ;;  %vm823_vm0 = vmmov 0   ;;  %s1067_s0 = inlined_call_operand.vmem [shape: bf16[8,128], index: 0, kind: input, shape index: {}]   ;;  %s1068_s1 = inlined_call_operand.vmem [shape: bf16[128,128], index: 1, kind: input, shape index: {}]   ;;  %s1069_s2 = inlined_call_operand.vmem [shape: bf16[128,256], index: 2, kind: input, shape index: {}]   ;;  %s1070_s3 = inlined_call_operand.vmem [shape: bf16[256,128], index: 3, kind: input, shape index: {}]   ;;  %s1071_s4 = inlined_call_operand.vmem [shape: bf16[128,128], index: 4, kind: input, shape index: {}]   ;;  %s1072_s5 = inlined_call_operand.vmem [shape: f32[1,128], index: 5, kind: input, shape index: {}]   ;;  %s1073_s6 = inlined_call_operand.vmem [shape: f32[1,256], index: 6, kind: input, shape index: {}]   ;;  %s1074_s7 = inlined_call_operand.vmem [shape: f32[1,128], index: 7, kind: input, shape index: {}]   ;;  %s1075_s8 = inlined_call_operand.vmem [shape: f32[1,128], index: 8, kind: input, shape index: {}]   ;;  %s1076_s9 = inlined_call_operand.hbm [shape: f32[8,128], index: 9, kind: output, shape index: {}]  }
   0x1   :  { %v742_v0 = vld [vmem:[%s1068_s1] sm:$0xff]   ;;  %698 = vmatprep.subr.bf16.mxu0 %v822_v1  ;;  %v743_v2 = vld [vmem:[%s1068_s1 + $0x8] sm:$0xff]   ;;  %714 = vmatprep.mubr.msk.bf16.mxu0 %vm823_vm0, %v822_v1  ;;  %v744_v3 = vld [vmem:[%s1068_s1 + $0x10] sm:$0xff]  }
   0x2   :  { %699 = vmatpush3.bf16.msra.mxu0 %v742_v0  ;;  %v750_v4 = vld [vmem:[%s1069_s2 + $0x4] ss:$8 sps:$4 sm:$0xff]   ;;  %v752_v5 = vld [vmem:[%s1069_s2] ss:$8 sps:$4 sm:$0xff]   ;;  %v745_v6 = vld [vmem:[%s1068_s1 + $0x18] sm:$0xff]  }
   0x3   :  { %700 = vmatprep.subr.bf16.mxu0 %v822_v1  ;;  %v753_v7 = vld [vmem:[%s1069_s2 + $0x14] ss:$8 sps:$4 sm:$0xff]   ;;  %258 = vmatprep.subr.bf16.mxu1 %v750_v4  ;;  %v755_v8 = vld [vmem:[%s1069_s2 + $0x10] ss:$8 sps:$4 sm:$0xff]   ;;  %v756_v9 = vld [vmem:[%s1069_s2 + $0x24] ss:$8 sps:$4 sm:$0xff]  }
   0x4   :  { %259 = vmatpush1.bf16.msra.mxu1 %v752_v5  ;;  %v746_v10 = vld [vmem:[%s1068_s1 + $0x20] sm:$0xff]   ;;  %v747_v11 = vld [vmem:[%s1068_s1 + $0x28] sm:$0xff]   ;;  %v759_v13 = vld [vmem:[%s1069_s2 + $0x34] ss:$8 sps:$4 sm:$0xff]  }
   0x5   :  { %260 = vmatprep.subr.bf16.mxu1 %v753_v7  ;;  %v758_v12 = vld [vmem:[%s1069_s2 + $0x20] ss:$8 sps:$4 sm:$0xff]   ;;  %v761_v14 = vld [vmem:[%s1069_s2 + $0x30] ss:$8 sps:$4 sm:$0xff]   ;;  %v762_v15 = vld [vmem:[%s1069_s2 + $0x44] ss:$8 sps:$4 sm:$0xff]  }
   0x6   :  { %701 = vmatpush3.bf16.msra.mxu0 %v743_v2  ;;  %v748_v16 = vld [vmem:[%s1068_s1 + $0x30] sm:$0xff]   ;;  %v764_v17 = vld [vmem:[%s1069_s2 + $0x40] ss:$8 sps:$4 sm:$0xff]   ;;  %v749_v19 = vld [vmem:[%s1068_s1 + $0x38] sm:$0xff]  }
   0x7   :  { %702 = vmatprep.subr.bf16.mxu0 %v822_v1  ;;  %v765_v18 = vld [vmem:[%s1069_s2 + $0x54] ss:$8 sps:$4 sm:$0xff]   ;;  %v767_v20 = vld [vmem:[%s1069_s2 + $0x50] ss:$8 sps:$4 sm:$0xff]   ;;  %v34_v21 = vld [vmem:[%s1067_s0] sm:$0xf] }
   0x8   :  { %261 = vmatpush1.bf16.msra.mxu1 %v755_v8 }
   0x9   :  { %262 = vmatprep.subr.bf16.mxu1 %v756_v9 }
   0xa   :  { %703 = vmatpush3.bf16.msra.mxu0 %v744_v3 }
   0xb   :  { %704 = vmatprep.subr.bf16.mxu0 %v822_v1 }
   0xc   :  { %263 = vmatpush1.bf16.msra.mxu1 %v758_v12 }
   0xd   :  { %264 = vmatprep.subr.bf16.mxu1 %v759_v13 }
   0xe   :  { %705 = vmatpush3.bf16.msra.mxu0 %v745_v6 }
   0xf   :  { %706 = vmatprep.subr.bf16.mxu0 %v822_v1 }
  0x10   :  { %265 = vmatpush1.bf16.msra.mxu1 %v761_v14 }
  0x11   :  { %266 = vmatprep.subr.bf16.mxu1 %v762_v15 }
  0x12   :  { %707 = vmatpush3.bf16.msra.mxu0 %v746_v10 }
  0x13   :  { %708 = vmatprep.subr.bf16.mxu0 %v822_v1 }
  0x14   :  { %267 = vmatpush1.bf16.msra.mxu1 %v764_v17 }
  0x15   :  { %268 = vmatprep.subr.bf16.mxu1 %v765_v18 }
  0x16   :  { %709 = vmatpush3.bf16.msra.mxu0 %v747_v11 }
  0x17   :  { %710 = vmatprep.subr.bf16.mxu0 %v822_v1 }
  0x18   :  { %269 = vmatpush1.bf16.msra.mxu1 %v767_v20 }
  0x1a   :  { %711 = vmatpush3.bf16.msra.mxu0 %v748_v16 }
  0x1b   :  { %712 = vmatprep.subr.bf16.mxu0 %v822_v1 }
  0x1e   :  { %713 = vmatpush3.bf16.msra.mxu0 %v749_v19 }
  0x21   :  { %715 = vmatmul.mubr.bf16.vlgmr.msra.gmra.mrb[0].mxu0 %v34_v21 }
  0x22   :  { %14 = vsyncpa [#allocation3], 0  ;;  %v768_v22 = vld [vmem:[%s1069_s2 + $0x64] ss:$8 sps:$4 sm:$0xff]   ;;  %v770_v23 = vld [vmem:[%s1069_s2 + $0x60] ss:$8 sps:$4 sm:$0xff]   ;;  %v35_v41 = vunpack.c.l.bf16 %v34_v21  ;;  %v168_v59 = vlaneseq }
  0x23   :  { %270 = vmatprep.subr.bf16.mxu1 %v768_v22  ;;  %v771_v24 = vld [vmem:[%s1069_s2 + $0x74] ss:$8 sps:$4 sm:$0xff]   ;;  %v773_v25 = vld [vmem:[%s1069_s2 + $0x70] ss:$8 sps:$4 sm:$0xff]   ;;  %v824_v26 = vmov 0   ;;  %v774_v27 = vld [vmem:[%s1070_s3 + $0x40] sm:$0xff]  }
  0x24   :  { %271 = vmatpush1.bf16.msra.mxu1 %v770_v23  ;;  %290 = vmatprep.mubr.bf16.mxu1 %v824_v26  ;;  %v775_v28 = vld [vmem:[%s1070_s3] sm:$0xff]   ;;  %v776_v29 = vld [vmem:[%s1070_s3 + $0x48] sm:$0xff]   ;;  %v778_v31 = vld [vmem:[%s1070_s3 + $0x50] sm:$0xff]   ;;  %v169_v60 = vshrl.u32 %v168_v59, 7 }
  0x25   :  { %272 = vmatprep.subr.bf16.mxu1 %v771_v24  ;;  %667 = vmatprep.subr.bf16.mxu0 %v774_v27  ;;  %v777_v30 = vld [vmem:[%s1070_s3 + $0x8] sm:$0xff]   ;;  %v779_v32 = vld [vmem:[%s1070_s3 + $0x10] sm:$0xff]   ;;  %v780_v33 = vld [vmem:[%s1070_s3 + $0x58] sm:$0xff]  }
  0x26   :  { %668 = vmatpush3.bf16.msra.mxu0 %v775_v28  ;;  %v781_v34 = vld [vmem:[%s1070_s3 + $0x18] sm:$0xff]   ;;  %v782_v35 = vld [vmem:[%s1070_s3 + $0x60] sm:$0xff]   ;;  %v784_v37 = vld [vmem:[%s1070_s3 + $0x68] sm:$0xff]   ;;  %v170_v61 = vsub.s32 0, %v169_v60  ;;  %v174_v63 = vsub.s32 1, %v169_v60 }
  0x27   :  { %669 = vmatprep.subr.bf16.mxu0 %v776_v29  ;;  %v783_v36 = vld [vmem:[%s1070_s3 + $0x20] sm:$0xff]   ;;  %v785_v38 = vld [vmem:[%s1070_s3 + $0x28] sm:$0xff]   ;;  %v786_v49 = vld [vmem:[%s1070_s3 + $0x70] sm:$0xff]  }
  0x28   :  { %273 = vmatpush1.bf16.msra.mxu1 %v773_v25  ;;  %v607_v39 = vld [vmem:[%s1072_s5] ss:$0 sm:$0xff]  ;;  %v787_v50 = vld [vmem:[%s1070_s3 + $0x30] sm:$0xff]   ;;  %v788_v51 = vld [vmem:[%s1070_s3 + $0x78] sm:$0xff]  }
  0x29   :  { %718 = vmatprep.subr.bf16.mxu1 %v822_v1  ;;  %v789_v52 = vld [vmem:[%s1070_s3 + $0x38] sm:$0xff]   ;;  %v790_v53 = vld [vmem:[%s1071_s4] sm:$0xff]   ;;  %v791_v54 = vld [vmem:[%s1071_s4 + $0x8] sm:$0xff]  }
  0x2a   :  { %670 = vmatpush3.bf16.msra.mxu0 %v777_v30  ;;  %v792_v55 = vld [vmem:[%s1071_s4 + $0x10] sm:$0xff]   ;;  %v793_v56 = vld [vmem:[%s1071_s4 + $0x18] sm:$0xff]   ;;  %v794_v57 = vld [vmem:[%s1071_s4 + $0x20] sm:$0xff]  }
  0x2b   :  { %671 = vmatprep.subr.bf16.mxu0 %v778_v31  ;;  %v795_v58 = vld [vmem:[%s1071_s4 + $0x28] sm:$0xff]   ;;  %v166_v62 = vld [vmem:[%s1073_s6] sm:$0x3]  ;;  %v796_v13 = vld [vmem:[%s1071_s4 + $0x30] sm:$0xff]  }
  0x2c   :  { %v171_v0 = vrot.slane %v166_v62, %v170_v61  ;;  %v175_v2 = vrot.slane %v166_v62, %v174_v63  ;;  %v797_v14 = vld [vmem:[%s1071_s4 + $0x38] sm:$0xff]   ;;  %v632_v16 = vld [vmem:[%s1074_s7] ss:$0 sm:$0xff]  ;;  %s825_s4 = smov [#allocation2]  }
  0x2d   :  { %s599_s20 = sshll.u32 %s825_s4, 4  ;;  %s600_s20 = int_to_ptr.vmem [resolvable:$true] %s599_s20 }
  0x2e   :  { %672 = vmatpush3.bf16.msra.mxu0 %v779_v32  ;;  %s798_s7 = scalar_lea.vmem %s600_s20, 128  ;;  %p803_p1 = scmp.lt.s32.totalorder %s600_s20, %s600_s20 }
  0x2f   :  { %673 = vmatprep.subr.bf16.mxu0 %v780_v33  ;;  %p799_p0 = scmp.ne.s32.totalorder %s600_s20, %s798_s7  ;;  %p804_p2 = scmp.lt.s32.totalorder %s798_s7, %s798_s7 }
  0x31   :  { %p805_p3 = por %p804_p2, %p803_p1 }
  0x32   :  { %674 = vmatpush3.bf16.msra.mxu0 %v781_v34 }
  0x33   :  { %675 = vmatprep.subr.bf16.mxu0 %v782_v35  ;;  %p806_p4 = pnand %p805_p3, %p799_p0 }
  0x36   :  { %676 = vmatpush3.bf16.msra.mxu0 %v783_v36 }
  0x37   :  { %677 = vmatprep.subr.bf16.mxu0 %v784_v37 }
  0x3a   :  { %678 = vmatpush3.bf16.msra.mxu0 %v785_v38 }
  0x3b   :  { %679 = vmatprep.subr.bf16.mxu0 %v786_v49 }
  0x3e   :  { %680 = vmatpush3.bf16.msra.mxu0 %v787_v50 }
  0x3f   :  { %681 = vmatprep.subr.bf16.mxu0 %v788_v51 }
  0x42   :  { %682 = vmatpush3.bf16.msra.mxu0 %v789_v52 }
  0xf4   :  { %v141_v40 = vpop.f32.mrb[0].mxu0 }
  0xf5   :  { %v142_v42 = vadd.f32 %v607_v39, %v141_v40  ;;  %v716_v43 = vpop.f32.mrb[1].mxu0 }
  0xf6   :  { %v144_v44 = vpop.f32.mrb[2].mxu0 }
  0xf7   :  { %v147_v45 = vmax.f32 %v142_v42, 0.0  ;;  %v717_v46 = vpop.f32.mrb[3].mxu0 }
  0xf9   :  { %v148_v47 = vadd.f32 %v147_v45, %v35_v41 }
  0xfb   :  { %v149_v48 = vpack.c.bf16 %v148_v47, %v148_v47 }
  0xfd   :  { %291 = vmatmul.mubr.bf16.vlgmr.msra.gmra.mrb[0].mxu1 %v149_v48 }
  0xfe   :  { %734 = vmatprep.mubr.msk.bf16.mxu1 %vm823_vm0, %v822_v1  ;;  %719 = vmatpush3.bf16.msra.mxu1 %v790_v53 }
  0xff   :  { %720 = vmatprep.subr.bf16.mxu1 %v822_v1 }
 0x102   :  { %721 = vmatpush3.bf16.msra.mxu1 %v791_v54 }
 0x103   :  { %722 = vmatprep.subr.bf16.mxu1 %v822_v1 }
 0x106   :  { %723 = vmatpush3.bf16.msra.mxu1 %v792_v55 }
 0x107   :  { %724 = vmatprep.subr.bf16.mxu1 %v822_v1 }
 0x10a   :  { %725 = vmatpush3.bf16.msra.mxu1 %v793_v56 }
 0x10b   :  { %726 = vmatprep.subr.bf16.mxu1 %v822_v1 }
 0x10e   :  { %727 = vmatpush3.bf16.msra.mxu1 %v794_v57 }
 0x10f   :  { %728 = vmatprep.subr.bf16.mxu1 %v822_v1 }
 0x112   :  { %729 = vmatpush3.bf16.msra.mxu1 %v795_v58 }
 0x113   :  { %730 = vmatprep.subr.bf16.mxu1 %v822_v1 }
 0x116   :  { %731 = vmatpush3.bf16.msra.mxu1 %v796_v13 }
 0x117   :  { %732 = vmatprep.subr.bf16.mxu1 %v822_v1  ;;  %v649_v1 = vld [vmem:[%s1075_s8] ss:$0 sm:$0xff] }
 0x11a   :  { %733 = vmatpush3.bf16.msra.mxu1 %v797_v14 }
 0x1d0   :  { %v292_v3 = vpop.f32.mrb[0].mxu1 }
 0x1d1   :  { %v293_v4 = vadd.f32 %v292_v3, %v171_v0  ;;  %v294_v5 = vpop.f32.mrb[1].mxu1 }
 0x1d2   :  { %v295_v6 = vadd.f32 %v294_v5, %v175_v2  ;;  %v296_v7 = vpop.f32.mrb[2].mxu1 }
 0x1d3   :  { %v299_v8 = vmax.f32 %v293_v4, 0.0  ;;  %v297_v9 = vpop.f32.mrb[3].mxu1 }
 0x1d4   :  { %v300_v10 = vmax.f32 %v295_v6, 0.0 }
 0x1d5   :  { %v301_v12 = vpack.c.bf16 %v299_v8, %v299_v8 }
 0x1d6   :  { %v302_v11 = vpack.c.bf16 %v300_v10, %v300_v10 }
 0x1d8   :  { %470 = vmatprep.mubr.bf16.mxu0 %v302_v11 }
 0x1d9   :  { %471 = vmatmul.mubr.bf16.vlgmr.msra.gmra.mrb[4].mxu0 %v301_v12 }
 0x2ac   :  { %v683_v15 = vpop.f32.mrb[4].mxu0 }
 0x2ad   :  { %v684_v17 = vpop.f32.mrb[5].mxu0 }
 0x2ae   :  { %v685_v18 = vadd.f32 %v684_v17, %v683_v15  ;;  %v686_v19 = vpop.f32.mrb[6].mxu0 }
 0x2af   :  { %v687_v20 = vpop.f32.mrb[7].mxu0 }
 0x2b0   :  { %v473_v21 = vadd.f32 %v685_v18, %v632_v16 }
 0x2b2   :  { %v478_v22 = vmax.f32 %v473_v21, 0.0 }
 0x2b4   :  { %v479_v23 = vpack.c.bf16 %v478_v22, %v478_v22 }
 0x2b6   :  { %735 = vmatmul.mubr.bf16.vlgmr.msra.gmra.mrb[4].mxu1 %v479_v23 }
 0x389   :  { %v585_v24 = vpop.f32.mrb[4].mxu1 }
 0x38a   :  { %v586_v25 = vadd.f32 %v649_v1, %v585_v24  ;;  %v736_v26 = vpop.f32.mrb[5].mxu1 }
 0x38b   :  { %v588_v27 = vpop.f32.mrb[6].mxu1 }
 0x38c   :  { %v737_v28 = vpop.f32.mrb[7].mxu1  ;;  %v591_v29 = vadd.f32 %v586_v25, %v478_v22 }
 0x38e   :  { %592 = vst [vmem:[#allocation2] sm:$0xff] %v591_v29 }
 0x38f   :  { %809 = shalt.err (!%p806_p4)
}
 0x390   :  { %s810_s8 = scalar_lea.hbm %s1076_s9, 128 }
 0x391   :  { %p811_p5 = scmp.ne.s32.totalorder %s1076_s9, %s810_s8  ;;  %p814_p6 = scmp.lt.u32.totalorder %s810_s8, %s1076_s9 }
 0x393   :  { %p816_p7 = pnand %p814_p6, %p811_p5 }
 0x395   :  { %819 = shalt.err (!%p816_p7)
}
 0x396   :  { %602 = dma.vmem_to_hbm [thread:$0]  %s600_s20, 128, %s1076_s9, [#allocation3]  }
 0x397   :  { %820 = dma.done.wait [#allocation3], 128  }
 0x398   :  { %821 = vsyncadd [#allocation3], 4294967168 }
 0x399   :  { %606 = vsyncpa [#allocation3], 1 }

</bundles_post_ra>
